<compile_context>
chip_gen: v6e
topology: v6e:2x2x1
jax: 0.10.0
libtpu: 0.0.40
codegen_flags: <defaults>
</compile_context>

<pallas_src>
from functools import partial

import jax
import jax.numpy as jnp
from jax.experimental import pallas as pl
from jax.experimental.pallas import tpu as pltpu

COEF = 0.97


def _vmem_budget_bytes():
    """(per-grid-step footprint budget, vmem_limit_bytes) chosen per generation."""
    try:
        vmem_cap = getattr(pltpu.get_tpu_info(), "vmem_capacity_bytes",
                           64 * 1024 * 1024)
    except Exception:  # no TPU info available -> assume the smallest (v7x-like)
        vmem_cap = 64 * 1024 * 1024
    if vmem_cap >= 100 * 1024 * 1024:          # v5e / v6e: 128 MiB physical VMEM
        return 16 * 1024 * 1024, 64 * 1024 * 1024
    return 8 * 1024 * 1024, 48 * 1024 * 1024   # v7x: 64 MiB physical VMEM


def _preemphasis_kernel_whole_t(x_ref, o_ref, *, coef):
    """One (TB, T) tile: the whole time axis is in this block (no carry)."""
    x = x_ref[...]                                     # (TB, T)
    # prev[:, 0] = x[:, 1] (reflect pad), prev[:, t] = x[:, t-1] for t >= 1.
    prev = jnp.concatenate([x[:, 1:2], x[:, :-1]], axis=1)
    o_ref[...] = (x - coef * prev).astype(o_ref.dtype)


def _preemphasis_kernel_tiled_t(x_ref, carry_ref, o_ref, *, coef):
    """One (TB, TT) tile. carry_ref is a narrow (TB, 128) chunk of the input
    whose last column is x[:, j*TT - 1]; only meaningful for time tiles j > 0."""
    j = pl.program_id(1)                               # time-tile index
    x = x_ref[...]                                     # (TB, TT)
    c_last = carry_ref.shape[-1] - 1
    carried = carry_ref[:, c_last:]                    # (TB, 1)  x[:, j*TT - 1]
    reflect = x[:, 1:2]                                # (TB, 1)  reflect pad for j == 0
    first_prev = jnp.where(j == 0, reflect, carried)   # (TB, 1)
    prev = jnp.concatenate([first_prev, x[:, :-1]], axis=1)
    o_ref[...] = (x - coef * prev).astype(o_ref.dtype)


def _pick_tiles(B, T, itemsize, budget):
    """Choose (TB, TT) so ~6 * TB * TT * itemsize stays under `budget`
    (2x in double-buffer + 2x out double-buffer + in-kernel `prev` temp + slack),
    respecting the (8, 128) block-shape rule, and guaranteeing >= 2 grid steps
    for arrays big enough to benefit (megacore sharding + DMA/compute overlap)."""
    def fits(tb, tt):
        return 6 * tb * tt * itemsize <= budget

    want_multi = B * T * itemsize > (1 << 20)   # > 1 MiB: want >= 2 grid steps
    min_tb = B if B <= 8 else 8

    if fits(min_tb, T):
        # Preferred: keep T whole -> lane-dense blocks, no carry operand.
        tt = T
        tb = min_tb
        while tb * 2 <= B and fits(tb * 2, T):
            tb *= 2
        if fits(B, T) and not (want_multi and B > min_tb):
            tb = B                               # single full-B block is fine
        if want_multi and B > min_tb:
            # make sure the batch axis yields >= 2 steps (tb stays a mult. of 8)
            while tb > min_tb and pl.cdiv(B, tb) < 2:
                tb //= 2
        if want_multi and pl.cdiv(B, tb) < 2 and T >= 2 * 128:
            # can't split batch (B <= 8): split time into >= 2 lane-dense chunks
            tt = max(128, (T // 2) // 128 * 128)
            while not fits(tb, tt) and tt > 128:
                tt = max(128, (tt // 2) // 128 * 128)
        return tb, tt

    # Whole-T blocks don't fit even at the minimal batch tile: tile time.
    tb = min_tb
    lanes = max((budget // (6 * tb * itemsize)) // 128, 1)
    tt = min(int(lanes) * 128, T)
    return tb, tt


def pre_emphasis(x, coef=COEF, *, out_dtype=None, batch_tile=None, time_tile=None):
    """x: (B, T) waveform -> (B, T) pre-emphasized waveform.

    out_dtype: output dtype (default = input dtype). Passing jnp.bfloat16 keeps
    the f32 compute but halves HBM write traffic on this bandwidth-bound op.
    """
    B, T = x.shape
    assert T >= 2, "reflect padding needs T >= 2 (PyTorch errors too)"
    itemsize = jnp.dtype(x.dtype).itemsize
    out_dtype = x.dtype if out_dtype is None else jnp.dtype(out_dtype)
    out_itemsize = jnp.dtype(out_dtype).itemsize

    budget, vmem_limit = _vmem_budget_bytes()
    tb, tt = _pick_tiles(B, T, itemsize, budget)
    if batch_tile is not None:
        tb = batch_tile
    if time_tile is not None:
        tt = time_tile
    assert tb == B or tb % 8 == 0, "batch_tile must be a multiple of 8 or == B"
    assert tt == T or (tt >= 128 and tt % 128 == 0), \
        "time_tile must be a multiple of 128 (>= 128) or == T"

    grid_b, grid_t = pl.cdiv(B, tb), pl.cdiv(T, tt)
    grid = (grid_b, grid_t)

    x_spec = pl.BlockSpec((tb, tt), lambda i, j: (i, j))
    out_spec = pl.BlockSpec((tb, tt), lambda i, j: (i, j))

    if grid_t == 1:
        # Time axis untiled: no carry operand, single input stream.
        kernel = partial(_preemphasis_kernel_whole_t, coef=coef)
        in_specs = [x_spec]
        operands = (x,)
        carry_bytes = 0
    else:
        # Narrow carry block: the last 128 lanes of the previous time tile.
        # One tiny extra DMA per step instead of re-DMAing a full halo tile.
        c = 128
        chunks_per_tile = tt // c
        carry_spec = pl.BlockSpec(
            (tb, c), lambda i, j: (i, jnp.maximum(j * chunks_per_tile - 1, 0)))
        kernel = partial(_preemphasis_kernel_tiled_t, coef=coef)
        in_specs = [x_spec, carry_spec]
        operands = (x, x)
        carry_bytes = grid_b * grid_t * tb * c * itemsize

    return pl.pallas_call(
        kernel,
        out_shape=jax.ShapeDtypeStruct((B, T), out_dtype),
        grid=grid,
        in_specs=in_specs,
        out_specs=out_spec,
        compiler_params=pltpu.CompilerParams(
            # No cross-iteration state: every grid step depends only on its
            # own input blocks, so both axes can shard across TensorCores.
            dimension_semantics=("parallel", "parallel"),
            vmem_limit_bytes=vmem_limit,
        ),
        cost_estimate=pl.CostEstimate(
            flops=2 * B * T,
            transcendentals=0,
            bytes_accessed=B * T * itemsize + B * T * out_itemsize + carry_bytes,
        ),
    )(*operands)


def pre_emphasis_ref(x, coef=COEF):
    prev = jnp.concatenate([x[:, 1:2], x[:, :-1]], axis=1)  # reflect-pad left by 1
    return x - coef * prev


if __name__ == "__main__":
    # 1) Small shape matching the module's toy usage: batch=2, T=16
    #    (single full-extent block; grid = (1, 1); no-carry fast path).
    x_small = jax.random.normal(jax.random.PRNGKey(0), (2, 16), dtype=jnp.float32)
    y_small = jax.block_until_ready(pre_emphasis(x_small))
    assert y_small.shape == x_small.shape and y_small.dtype == x_small.dtype
    assert jnp.allclose(y_small, pre_emphasis_ref(x_small), atol=1e-6, rtol=1e-6), \
        "mismatch vs reference (small)"

    # 2) Shape that exercises the tiled-time path, including the carried
    #    previous-column across time tiles: grid = (2, 2).
    x_big = jax.random.normal(jax.random.PRNGKey(0), (16, 512), dtype=jnp.float32)
    y_big = jax.block_until_ready(pre_emphasis(x_big, batch_tile=8, time_tile=256))
    assert jnp.allclose(y_big, pre_emphasis_ref(x_big), atol=1e-6, rtol=1e-6), \
        "mismatch vs reference (tiled)"

    # 3) bf16 output (compute stays f32): halves HBM write traffic downstream.
    x_med = jax.random.normal(jax.random.PRNGKey(0), (8, 4096), dtype=jnp.float32)
    y_bf16 = jax.block_until_ready(pre_emphasis(x_med, out_dtype=jnp.bfloat16))
    assert y_bf16.dtype == jnp.bfloat16
    assert jnp.allclose(y_bf16.astype(jnp.float32), pre_emphasis_ref(x_med),
                        atol=5e-2, rtol=5e-2), "mismatch vs reference (bf16 out)"

    print("KERNEL_OK")
</pallas_src>

<mosaic_0001>
module attributes {stable_mosaic.version = 11 : i64} {
  func.func @_preemphasis_kernel_whole_t(%arg0: i32, %arg1: i32, %arg2: memref<2x16xf32, #tpu.memory_space<vmem>>, %arg3: memref<2x16xf32, #tpu.memory_space<vmem>>) attributes {dimension_semantics = [#tpu.dimension_semantics<parallel>, #tpu.dimension_semantics<parallel>], iteration_bounds = array<i64: 1, 1>, scalar_prefetch = 0 : i64, scratch_operands = 0 : i64, tpu.core_type = #tpu.core_type<tc>, window_params = [{transform_indices = @transform_0, window_bounds = array<i64: 2, 16>}, {transform_indices = @transform_1, window_bounds = array<i64: 2, 16>}]} {
    %c0 = arith.constant 0 : index
    %c0_0 = arith.constant 0 : index
    %0 = vector.load %arg2[%c0, %c0_0] : memref<2x16xf32, #tpu.memory_space<vmem>>, vector<2x16xf32>
    %1 = vector.extract_strided_slice %0 {offsets = [0, 1], sizes = [2, 1], strides = [1, 1]} : vector<2x16xf32> to vector<2x1xf32>
    %2 = vector.extract_strided_slice %0 {offsets = [0, 0], sizes = [2, 15], strides = [1, 1]} : vector<2x16xf32> to vector<2x15xf32>
    %3 = tpu.concatenate %1, %2 in 1 : vector<2x1xf32>, vector<2x15xf32> -> vector<2x16xf32>
    %cst = arith.constant 9.700000e-01 : f32
    %4 = vector.broadcast %cst : f32 to vector<2x16xf32>
    %5 = arith.mulf %4, %3 : vector<2x16xf32>
    %6 = arith.subf %0, %5 : vector<2x16xf32>
    %c0_1 = arith.constant 0 : index
    %c0_2 = arith.constant 0 : index
    %7 = vector.load %arg3[%c0_1, %c0_2] : memref<2x16xf32, #tpu.memory_space<vmem>>, vector<2x16xf32>
    tpu.vector_store %arg3[%c0_1, %c0_2], %6 {strides = array<i32>} : memref<2x16xf32, #tpu.memory_space<vmem>>, vector<2x16xf32>,
    return
  }
  func.func @transform_0(%arg0: i32, %arg1: i32) -> (i32, i32) {
    %c0_i32 = arith.constant 0 : i32
    return %arg0, %arg1 : i32, i32
  }
  func.func @transform_1(%arg0: i32, %arg1: i32) -> (i32, i32) {
    %c0_i32 = arith.constant 0 : i32
    return %arg0, %arg1 : i32, i32
  }
}

</mosaic_0001>

<bundles_post_ra>
// kernel: tpu_custom_call.1
= control target key start
LH: loop header
LB: loop body
LE: loop exit
PB: predicated region body
PF: predicated region fallthrough
CT: control target
= control target key end

     0   :  { %6 = vsyncpa [#allocation3], 0  ;;  %s118_s0 = inlined_call_operand.hbm [shape: f32[2,16], index: 0, kind: input, shape index: {}]   ;;  %s119_s1 = inlined_call_operand.hbm [shape: f32[2,16], index: 1, kind: output, shape index: {}]  }
   0x1   :  { %7 = vsyncpa [#allocation4], 0  ;;  %s98_s6 = smov [#allocation2]  }
   0x2   :  { %s14_s7 = sshll.u32 %s98_s6, 4  ;;  %s15_s7 = int_to_ptr.vmem [resolvable:$true] %s14_s7 }
   0x3   :  { %s62_s8 = scalar_lea.vmem %s15_s7, 32  ;;  %p67_p1 = scmp.lt.s32.totalorder %s15_s7, %s15_s7 }
   0x4   :  { %p63_p0 = scmp.ne.s32.totalorder %s15_s7, %s62_s8  ;;  %p68_p2 = scmp.lt.s32.totalorder %s62_s8, %s62_s8 }
   0x6   :  { %p69_p3 = por %p68_p2, %p67_p1 }
   0x8   :  { %p70_p4 = pnand %p69_p3, %p63_p0 }
   0xa   :  { %73 = shalt.err (!%p70_p4)
}
   0xb   :  { %17 = dma.hbm_to_vmem [thread:$0]  %s118_s0, 32, %s15_s7, [#allocation3]  }
   0xc   :  { %94 = dma.done.wait [#allocation3], 32  }
   0xd   :  { %95 = vsyncadd [#allocation3], 4294967264  ;;  %v21_v0 = vld [vmem:[#allocation2] sm:$0x3]  ;;  %s99_s11 = smov 127   ;;  %s100_s12 = smov 1  }
   0xe   :  { %23 = vrot.lane.b32.xlu0 %v21_v0, %s99_s11  ;;  %vm29_vm0 = vcmask 7168   ;;  %s101_s13 = smov [#allocation5]   ;;  %vm33_vm1 = vcmask 123904  }
   0xf   :  { %s41_s14 = sshll.u32 %s101_s13, 4  ;;  %s42_s14 = int_to_ptr.vmem [resolvable:$true] %s41_s14 }
  0x10   :  { %s74_s15 = scalar_lea.vmem %s42_s14, 32  ;;  %p79_p6 = scmp.lt.s32.totalorder %s42_s14, %s42_s14 }
  0x11   :  { %p75_p5 = scmp.ne.s32.totalorder %s42_s14, %s74_s15  ;;  %p80_p7 = scmp.lt.s32.totalorder %s74_s15, %s74_s15 }
  0x12   :  { %26 = vrot.lane.b32.xlu0 %v21_v0, %s100_s12 }
  0x13   :  { %p81_p8 = por %p80_p7, %p79_p6 }
  0x15   :  { %p82_p9 = pnand %p81_p8, %p75_p5 }
  0x80   :  { %v24_v1 = vpop.permute.xlu0 %23 }
  0x84   :  { %v27_v2 = vpop.permute.xlu0 %26 }
  0x85   :  { %v30_v3 = vsel %vm29_vm0, %v24_v1, %v27_v2 }
  0x86   :  { %v31_v4 = vmul.f32 0.97, %v30_v3 }
  0x88   :  { %v32_v5 = vsub.f32 %v21_v0, %v31_v4 }
  0x8a   :  { %34 = vst.msk [vmem:[#allocation5] sm:$0x3] %vm33_vm1, %v32_v5 }
  0x8b   :  { %85 = shalt.err (!%p82_p9)
}
  0x8c   :  { %44 = dma.vmem_to_hbm [thread:$0]  %s42_s14, 32, %s119_s1, [#allocation4]  }
  0x8d   :  { %96 = dma.done.wait [#allocation4], 32  }
  0x8e   :  { %97 = vsyncadd [#allocation4], 4294967264 }
  0x8f   :  { %48 = vsyncpa [#allocation3], 1 }
  0x90   :  { %49 = vsyncpa [#allocation4], 1 }

</bundles_post_ra>
